<compile_context>
chip_gen: v7x
topology: tpu7x:2x2x1
jax: 0.10.0
libtpu: 0.0.40
codegen_flags: <defaults>
</compile_context>

<pallas_src>
import functools

import jax
import jax.numpy as jnp
from jax.experimental import pallas as pl
from jax.experimental.pallas import tpu as pltpu


def _rmsnorm_kernel(x_ref, scale_ref, o_ref, *, eps):
    # x_ref: (TILE_ROWS, HIDDEN), scale_ref: (1, HIDDEN)
    x = x_ref[...].astype(jnp.float32)
    ms = jnp.mean(x * x, axis=-1, keepdims=True)   # per-row reduction (lane axis)
    rms = jnp.sqrt(ms)                             # EUP
    # eps added to rms to match the PyTorch module (differs from nn.RMSNorm's
    # rsqrt(ms + eps)). Exact divide so we hold 1e-5 parity with the reference.
    inv = 1.0 / (rms + eps)
    o_ref[...] = (scale_ref[...].astype(jnp.float32) * (x * inv)).astype(o_ref.dtype)


def _round_up(n, m):
    return ((n + m - 1) // m) * m


def _pick_tile_rows(rows, hidden, dtype_bytes):
    # Sublane packing granularity: 8 for 4-byte, 16 for 2-byte, 32 for 1-byte dtypes.
    row_multiple = max(8, 32 // max(dtype_bytes, 1))
    # Target ~2 MiB per x block. Double-buffered (in + out) => ~8 MiB resident,
    # safely inside scoped VMEM on v5e (16 MiB default) / v6e / v7x.
    target_block_bytes = 2 * 1024 * 1024
    tile_rows = target_block_bytes // max(hidden * dtype_bytes, 1)
    tile_rows = max(row_multiple, min(1024, tile_rows))
    tile_rows = (tile_rows // row_multiple) * row_multiple
    # Never make the block taller than the (rounded-up) row count.
    tile_rows = min(tile_rows, _round_up(rows, row_multiple))
    # Keep at least 2 grid steps when the input allows it, so the "parallel"
    # grid axis can actually be split across v7x's two TensorCores.
    if tile_rows >= rows and rows >= 2 * row_multiple:
        tile_rows = _round_up(-(-rows // 2), row_multiple)
    return max(tile_rows, row_multiple)


def rmsnorm(x, scale, eps=1e-5, tile_rows=None):
    """x: (..., hidden), scale: (hidden,). Returns same shape/dtype as x."""
    orig_shape = x.shape
    hidden = orig_shape[-1]
    rows = 1
    for d in orig_shape[:-1]:
        rows *= d

    x2d = x.reshape(rows, hidden)
    scale2d = scale.reshape(1, hidden)

    dtype_bytes = jnp.dtype(x.dtype).itemsize
    if tile_rows is None:
        tile_rows = _pick_tile_rows(rows, hidden, dtype_bytes)

    # No jnp.pad: ragged last block is handled (masked) by Pallas.
    grid = (pl.cdiv(rows, tile_rows),)

    # VMEM actually needed: double-buffered x-in and x-out blocks + resident scale.
    need_bytes = (2 * 2 * tile_rows * hidden * dtype_bytes
                  + 2 * hidden * jnp.dtype(scale.dtype).itemsize
                  + (1 << 20))
    vmem_limit = int(min(48 * 1024 * 1024, max(32 * 1024 * 1024, 2 * need_bytes)))

    cost = pl.CostEstimate(
        flops=3 * rows * hidden,
        transcendentals=rows,
        bytes_accessed=2 * rows * hidden * dtype_bytes
        + hidden * jnp.dtype(scale.dtype).itemsize,
    )

    out = pl.pallas_call(
        functools.partial(_rmsnorm_kernel, eps=eps),
        out_shape=jax.ShapeDtypeStruct((rows, hidden), x.dtype),
        grid_spec=pltpu.PrefetchScalarGridSpec(
            num_scalar_prefetch=0,
            grid=grid,
            in_specs=[
                pl.BlockSpec((tile_rows, hidden), lambda i: (i, 0)),
                # scale stays resident in VMEM across all grid steps (index (0,0)).
                pl.BlockSpec((1, hidden), lambda i: (0, 0)),
            ],
            out_specs=pl.BlockSpec((tile_rows, hidden), lambda i: (i, 0)),
        ),
        compiler_params=pltpu.CompilerParams(
            dimension_semantics=("parallel",),
            vmem_limit_bytes=vmem_limit,
        ),
        cost_estimate=cost,
    )(x2d, scale2d)

    return out.reshape(orig_shape)


if __name__ == "__main__":
    batch, seq, hidden = 2, 8, 128
    key = jax.random.PRNGKey(0)
    x = jax.random.normal(key, (batch, seq, hidden), dtype=jnp.float32)
    # deterministic parameter init: scale = ones(hidden), matching nn.Parameter(torch.ones(hidden))
    scale = jnp.ones((hidden,), dtype=jnp.float32)
    eps = 1e-5

    out = rmsnorm(x, scale, eps=eps)
    jax.block_until_ready(out)

    # reference check in plain JAX (mirrors the PyTorch forward exactly)
    rms_ref = jnp.sqrt(jnp.mean(x * x, axis=-1, keepdims=True))
    ref = scale * (x / (rms_ref + eps))
    assert out.shape == x.shape and out.dtype == x.dtype
    assert jnp.allclose(out, ref, atol=1e-5, rtol=1e-5)
    print("KERNEL_OK")
</pallas_src>

<mosaic_0001>
module attributes {stable_mosaic.version = 11 : i64} {
  func.func @_rmsnorm_kernel(%arg0: i32, %arg1: memref<8x128xf32, #tpu.memory_space<vmem>>, %arg2: memref<1x128xf32, #tpu.memory_space<vmem>>, %arg3: memref<8x128xf32, #tpu.memory_space<vmem>>) attributes {dimension_semantics = [#tpu.dimension_semantics<parallel>], iteration_bounds = array<i64: 2>, scalar_prefetch = 0 : i64, scratch_operands = 0 : i64, tpu.core_type = #tpu.core_type<tc>, window_params = [{transform_indices = @transform_0, window_bounds = array<i64: 8, 128>}, {pipeline_mode = #tpu.pipeline_mode<synchronous>, transform_indices = @transform_1, window_bounds = array<i64: 1, 128>}, {transform_indices = @transform_2, window_bounds = array<i64: 8, 128>}]} {
    %c0 = arith.constant 0 : index
    %c0_0 = arith.constant 0 : index
    %0 = vector.load %arg1[%c0, %c0_0] : memref<8x128xf32, #tpu.memory_space<vmem>>, vector<8x128xf32>
    %1 = arith.mulf %0, %0 : vector<8x128xf32>
    %cst = arith.constant dense<0.000000e+00> : vector<8xf32>
    %2 = vector.multi_reduction <add>, %1, %cst [1] : vector<8x128xf32> to vector<8xf32>
    %3 = vector.shape_cast %2 : vector<8xf32> to vector<8x1xf32>
    %cst_1 = arith.constant 1.280000e+02 : f32
    %4 = vector.broadcast %cst_1 : f32 to vector<8x1xf32>
    %5 = arith.divf %3, %4 : vector<8x1xf32>
    %6 = math.sqrt %5 : vector<8x1xf32>
    %cst_2 = arith.constant 9.99999974E-6 : f32
    %7 = vector.broadcast %cst_2 : f32 to vector<8x1xf32>
    %8 = arith.addf %6, %7 : vector<8x1xf32>
    %cst_3 = arith.constant 1.000000e+00 : f32
    %9 = vector.broadcast %cst_3 : f32 to vector<8x1xf32>
    %10 = arith.divf %9, %8 : vector<8x1xf32>
    %c0_4 = arith.constant 0 : index
    %c0_5 = arith.constant 0 : index
    %11 = vector.load %arg2[%c0_4, %c0_5] : memref<1x128xf32, #tpu.memory_space<vmem>>, vector<1x128xf32>
    %12 = vector.broadcast %10 : vector<8x1xf32> to vector<8x128xf32>
    %13 = arith.mulf %0, %12 : vector<8x128xf32>
    %14 = vector.broadcast %11 : vector<1x128xf32> to vector<8x128xf32>
    %15 = arith.mulf %14, %13 : vector<8x128xf32>
    %c0_6 = arith.constant 0 : index
    %c0_7 = arith.constant 0 : index
    %16 = vector.load %arg3[%c0_6, %c0_7] : memref<8x128xf32, #tpu.memory_space<vmem>>, vector<8x128xf32>
    tpu.vector_store %arg3[%c0_6, %c0_7], %15 {strides = array<i32>} : memref<8x128xf32, #tpu.memory_space<vmem>>, vector<8x128xf32>,
    return
  }
  func.func @transform_0(%arg0: i32) -> (i32, i32) {
    %c0_i32 = arith.constant 0 : i32
    %c0_i32_0 = arith.constant 0 : i32
    return %arg0, %c0_i32 : i32, i32
  }
  func.func @transform_1(%arg0: i32) -> (i32, i32) {
    %c0_i32 = arith.constant 0 : i32
    %c0_i32_0 = arith.constant 0 : i32
    %c0_i32_1 = arith.constant 0 : i32
    return %c0_i32, %c0_i32_0 : i32, i32
  }
  func.func @transform_2(%arg0: i32) -> (i32, i32) {
    %c0_i32 = arith.constant 0 : i32
    %c0_i32_0 = arith.constant 0 : i32
    return %arg0, %c0_i32 : i32, i32
  }
}

</mosaic_0001>

<bundles_post_ra>
// kernel: tpu_custom_call.1
= control target key start
LH: loop header
LB: loop body
LE: loop exit
PB: predicated region body
PF: predicated region fallthrough
CT: control target
= control target key end

     0   :  { %7 = vsyncpa [#allocation3], 0  ;;  %s611_s0 = inlined_call_operand.hbm [shape: f32[16,128], index: 0, kind: input, shape index: {}]   ;;  %s612_s1 = inlined_call_operand.vmem [shape: f32[1,128], index: 1, kind: input, shape index: {}]   ;;  %s613_s2 = inlined_call_operand.hbm [shape: f32[16,128], index: 2, kind: output, shape index: {}]  }
   0x1   :  { %9 = vsyncpa [#allocation3 + $0x1], 0 }
   0x2   :  { %10 = vsyncpa [#allocation4], 0 }
   0x3   :  { %12 = vsyncpa [#allocation4 + $0x1], 0  ;;  %s447_s9 = smov 0   ;;  %s449_s10 = smov 0  }
   0x4   :  { %s451_s11 = smov 0   ;;  %s453_s12 = smov 0  }
   0x5 LB: > { %s468_s13 = sadd.s32 4294967295, %s428_s12   ;;  %s269_s14 = sadd.s32 4294967294, %s428_s12   ;;  %s428_s12 = sphi %s453_s12, %s628_s12   ;;  %s424_s11 = sphi %s451_s11, %s627_s11   ;;  %s420_s10 = sphi %s449_s10, %s626_s10   ;;  %s416_s9 = sphi %s447_s9, %s625_s9  }
   0x6   : > { %s472_s15 = sadd.s32 1, %s428_s12   ;;  %s25_s16 = sadd.s32 1, %s424_s11 }
   0x7   : > { %s22_s17 = ssub.s32 %s428_s12, %s472_s15  ;;  %p32_p0 = scmp.ne.s32.totalorder %s424_s11, %s420_s10 }
   0x8   : > { %p23_p1 = scmp.eq.s32.totalorder %s22_s17, 0  ;;  %p33_p2 = scmp.eq.s32.totalorder %s428_s12, 0 }
   0x9   : > { %p38_p3 = scmp.ne.s32.totalorder %s420_s10, %s416_s9  ;;  %p39_p4 = scmp.eq.s32.totalorder %s468_s13, 0 }
   0xa   : > { %s484_s18 = scalar_select %p23_p1, %s424_s11, %s25_s16  }
   0xb   : > { %p486_p5 = por %p33_p2, %p32_p0  ;;  %p490_p6 = por %p39_p4, %p38_p3 }
   0xc   : > { %p83_p7 = scmp.eq.s32.totalorder %s468_s13, 1  ;;  %p89_p8 = scmp.eq.s32.totalorder %s269_s14, 1 }
   0xd   : > { %p294_p10 = scmp.lt.s32.totalorder %s428_s12, 2  ;;  %s112_s23 = sand.u32 1, %s424_s11  }
   0xe   : > { %p497_p11 = por %p83_p7, %p32_p0  ;;  %p501_p12 = por %p89_p8, %p38_p3 }
   0xf   : > { %s273_s24 = sshll.u32 %s428_s12, 7  ;;  %s272_s25 = sshll.u32 %s112_s23, 3 }
  0x10   : > { %s617_s21 = scalar_select %p497_p11, 1, 0 }
  0x11   : > { %s618_s22 = scalar_select %p501_p12, 1, 0 }
  0x12   : > { %s510_s28 = scalar_lea.hbm %s611_s0, %s273_s24  ;;  %s116_s29 = scalar_lea.vmem [#allocation2], %s272_s25 }
  0x13   : > { %s123_s30 = sshll.u32 %s116_s29, 4  ;;  %p514_p13 = pnand %p294_p10, %p486_p5  ;;  %s518_s30 = int_to_ptr.vmem [resolvable:$true] %s123_s30 }
  0x14   : > { %s113_s4 = scalar_lea.sflag [#allocation3], %s112_s23  ;;  %s332_s5 = scalar_lea.hbm %s510_s28, 128 }
  0x15   : > { %p333_p2 = scmp.ne.s32.totalorder %s510_s28, %s332_s5  ;;  %p334_p3 = pneg %p514_p13 }
  0x16   : > { %s337_s8 = scalar_lea.hbm %s611_s0, 256  ;;  %p338_p5 = scmp.lt.u32.totalorder %s510_s28, %s611_s0 }
  0x17   : > { %p335_p4 = pnand %p334_p3, %p333_p2  ;;  %p339_p8 = scmp.lt.u32.totalorder %s337_s8, %s332_s5 }
  0x18   : > { %p341_p9 = scmp.lt.u32.totalorder %s332_s5, %s510_s28 }
  0x19   : > { %p336_p7 = pneg %p335_p4  ;;  %p340_p10 = por %p339_p8, %p338_p5 }
  0x1b   : > { %p342_p0 = por %p341_p9, %p340_p10 }
  0x1d   : > { %p343_p1 = pnand %p342_p0, %p336_p7 }
  0x1f   : > { %346 = shalt.err (!%p343_p1)
}
  0x20   : > { %s347_s17 = scalar_lea.vmem %s518_s30, 128  ;;  %s430_s19 = smov [#allocation2]  }
  0x21   : > { %p348_p2 = scmp.ne.s32.totalorder %s518_s30, %s347_s17  ;;  %s352_s23 = sshll.u32 %s430_s19, 4  ;;  %s353_s23 = int_to_ptr.vmem [resolvable:$false] %s352_s23 }
  0x22   : > { %s354_s24 = scalar_lea.vmem %s353_s23, 256  ;;  %p355_p11 = scmp.lt.s32.totalorder %s518_s30, %s353_s23 }
  0x23   : > { %p350_p4 = pnand %p348_p2, %p334_p3  ;;  %p356_p5 = scmp.lt.s32.totalorder %s354_s24, %s347_s17 }
  0x25   : > { %p351_p12 = pneg %p350_p4  ;;  %p357_p8 = por %p356_p5, %p355_p11 }
  0x27   : > { %p358_p9 = pnand %p357_p8, %p351_p12 }
  0x29   : > { %361 = shalt.err (!%p358_p9)
}
  0x2a   : > { %289 = dma.hbm_to_vmem [thread:$0]  (!%p514_p13), %s510_s28, 128, %s518_s30, %s113_s4  }
  0x2b   : > { %p620_p0 = scmp.lt.s32.totalorder %s428_s12, 3  ;;  %p621_p1 = scmp.ge.s32.totalorder %s428_s12, 1 }
  0x2d   : > { %p129_p3 = pnand %p621_p1, %p620_p0 }
  0x2e   : > { %s552_s25 = sand.u32 (!%p129_p3), 1, %s420_s10  }
  0x2f   : > { %132 = sbr.rel (%p129_p3) target bundleno = 248 (0xf8), region = 28  ;;  %s275_s26 = sshll.u32 (!%p129_p3), %s552_s25, 3 }
  0x30   : > { %s135_s27 = scalar_lea.sflag (!%p129_p3), [#allocation3], %s552_s25  ;;  %s138_s29 = scalar_lea.vmem (!%p129_p3), [#allocation2], %s275_s26 }
  0x36   : > { %407 = dma.done.wait (%p490_p6), %s135_s27, 128  }
  0x37   : > { %409 = vsyncadd (%p490_p6), %s135_s27, 4294967168  ;;  %v159_v0 = vld [vmem:[%s138_s29] sm:$0xff]  ;;  %s279_s30 = sshll.u32 %s468_s13, 7  ;;  %s158_s3 = scalar_lea.vmem [#allocation5], %s275_s26 }
  0x38   : > { %v160_v1 = vmul.f32 %v159_v0, %v159_v0  ;;  %v277_v11 = vld [vmem:[%s612_s1] ss:$0 sm:$0xff]  ;;  %s199_s4 = sshll.u32 %s158_s3, 4  ;;  %s567_s7 = scalar_lea.hbm %s613_s2, %s279_s30  ;;  %s569_s4 = int_to_ptr.vmem [resolvable:$true] %s199_s4 }
  0x39   : > { %s186_s8 = scalar_lea.sflag [#allocation4], %s552_s25  ;;  %s362_s14 = scalar_lea.vmem %s569_s4, 128 }
  0x3a   : > { %161 = vadd.xlane.f32.xlu0 %v160_v1  ;;  %p363_p6 = scmp.ne.s32.totalorder %s569_s4, %s362_s14  ;;  %p622_p11 = scmp.ne.s32.totalorder %s617_s21, 0 }
  0x3b   : > { %s431_s13 = smov [#allocation5]  }
  0x3c   : > { %p364_p12 = pnand %p363_p6, %p622_p11  ;;  %s366_s16 = sshll.u32 %s431_s13, 4  ;;  %s367_s16 = int_to_ptr.vmem [resolvable:$false] %s366_s16 }
  0x3d   : > { %s368_s17 = scalar_lea.vmem %s367_s16, 256  ;;  %p369_p7 = scmp.lt.s32.totalorder %s569_s4, %s367_s16 }
  0x3e   : > { %p365_p13 = pneg %p364_p12  ;;  %p370_p10 = scmp.lt.s32.totalorder %s368_s17, %s362_s14 }
  0x40   : > { %p371_p2 = por %p370_p10, %p369_p7 }
  0x42   : > { %p372_p4 = pnand %p371_p2, %p365_p13 }
  0xc7   : > { %v162_v2 = vpop.xlane.xlu0 %161 }
  0xc8   : > { %v164_v3 = vmul.f32 0.0078125, %v162_v2 }
  0xca   : > { %328 = vrsqrt.f32 %v164_v3  ;;  %vm167_vm0 = vcmp.eq.f32.partialorder %v164_v3, inf  ;;  %v170_v6 = vand.u32 2147483648, %v164_v3  ;;  %vm169_vm1 = vcmp.eq.f32.partialorder %v164_v3, 0.0 }
  0xd4   : > { %v329_v4 = vpop.eup %328 }
  0xd5   : > { %v166_v5 = vmul.f32 %v329_v4, %v164_v3 }
  0xd7   : > { %v168_v7 = vsel %vm167_vm0, %v164_v3, %v166_v5 }
  0xd8   : > { %v171_v8 = vsel %vm169_vm1, %v170_v6, %v168_v7 }
  0xd9   : > { %v172_v9 = vadd.f32 1e-05, %v171_v8 }
  0xdb   : > { %330 = vrcp.f32 %v172_v9 }
  0xe5   : > { %v331_v10 = vpop.eup %330 }
  0xe6   : > { %v176_v12 = vmul.f32 %v331_v10, %v159_v0 }
  0xe8   : > { %v183_v13 = vmul.f32 %v277_v11, %v176_v12 }
  0xea   : > { %184 = vst [vmem:[%s158_s3] sm:$0xff] %v183_v13 }
  0xeb   : > { %375 = shalt.err (!%p372_p4)
}
  0xec   : > { %s376_s19 = scalar_lea.hbm %s567_s7, 128  ;;  %s380_s25 = scalar_lea.hbm %s613_s2, 256 }
  0xed   : > { %p377_p5 = scmp.ne.s32.totalorder %s567_s7, %s376_s19  ;;  %p381_p0 = scmp.lt.u32.totalorder %s567_s7, %s613_s2 }
  0xee   : > { %p382_p1 = scmp.lt.u32.totalorder %s380_s25, %s376_s19  ;;  %p384_p6 = scmp.lt.u32.totalorder %s376_s19, %s567_s7 }
  0xef   : > { %p378_p8 = pnand %p377_p5, %p622_p11 }
  0xf0   : > { %p383_p3 = por %p382_p1, %p381_p0 }
  0xf1   : > { %p379_p9 = pneg %p378_p8 }
  0xf2   : > { %p385_p12 = por %p384_p6, %p383_p3 }
  0xf4   : > { %p386_p13 = pnand %p385_p12, %p379_p9 }
  0xf6   : > { %389 = shalt.err (!%p386_p13)
}
  0xf7   : > { %284 = dma.vmem_to_hbm [thread:$0]  (%p622_p11), %s569_s4, 128, %s567_s7, %s186_s8  }
  0xf8 PF: > { %s211_s29 = sand.u32 1, %s416_s9   ;;  %p623_p7 = scmp.ne.s32.totalorder %s618_s22, 0 }
  0xf9   : > { %p624_p10 = scmp.ge.s32.totalorder %s428_s12, 2  ;;  %s212_s20 = scalar_lea.sflag [#allocation4], %s211_s29 }
  0xfb   : > { %p291_p2 = pnand %p624_p10, %p623_p7 }
  0xfd   : > { %411 = dma.done.wait (!%p291_p2), %s212_s20, 128  }
  0xfe   : > { %413 = vsyncadd (!%p291_p2), %s212_s20, 4294967168  ;;  %p15_p4 = scmp.ge.s32.totalorder %s472_s15, 4   ;;  %s625_s9 = smov %s420_s10 }
  0xff   : > { %s626_s10 = smov %s424_s11  ;;  %s627_s11 = smov %s484_s18 }
 0x100   : > { %s628_s12 = smov %s472_s15  ;;  %17 = sbr.rel (!%p15_p4) target bundleno = 5 (0x5), region = 73 }
 0x107   :  { %217 = vsyncpa [#allocation3], 1 }
 0x108   :  { %219 = vsyncpa [#allocation3 + $0x1], 1 }
 0x109   :  { %220 = vsyncpa [#allocation4], 1 }
 0x10a   :  { %222 = vsyncpa [#allocation4 + $0x1], 1 }

</bundles_post_ra>
